<compile_context>
chip_gen: v5e
topology: v5e:2x2
jax: 0.10.0
libtpu: 0.0.40
codegen_flags: <defaults>
</compile_context>

<pallas_src>
import jax
import jax.numpy as jnp
from jax import lax
from jax.experimental import pallas as pl
from jax.experimental.pallas import tpu as pltpu

_EPS = 1e-8  # nn.CosineSimilarity default eps


def _round_up(n, m):
    return ((n + m - 1) // m) * m


def _pick_tile(bp):
    """Largest tile (multiple of 128, <=512) that divides the padded batch."""
    if bp <= 512:
        return bp
    for cand in (512, 384, 256, 128):
        if bp % cand == 0:
            return cand
    return 128


def _sim_kernel(x_ref, y_ref, ix_ref, iy_ref, o_ref):
    # Single K step: whole hidden dim resident.  Pure MXU matmul + VPU epilogue.
    dots = lax.dot_general(
        x_ref[...], y_ref[...],                      # [TM,K] x [TN,K]
        dimension_numbers=(((1,), (1,)), ((), ())),  # contract K with K -> [TM,TN]
        preferred_element_type=jnp.float32)
    # ix: [TM,1] (includes 1/temp), iy: [1,TN] lane-dense -> transpose-free broadcast.
    o_ref[...] = (dots * ix_ref[...] * iy_ref[...]).astype(o_ref.dtype)


def _sim_kernel_ksplit(x_ref, y_ref, ix_ref, iy_ref, o_ref, acc_ref):
    # Fallback for very large hidden dims: K-split with a VMEM f32 accumulator.
    k = pl.program_id(2)

    @pl.when(k == 0)
    def _():
        acc_ref[...] = jnp.zeros_like(acc_ref)

    acc_ref[...] += lax.dot_general(
        x_ref[...], y_ref[...],
        dimension_numbers=(((1,), (1,)), ((), ())),
        preferred_element_type=jnp.float32)

    @pl.when(k == pl.num_programs(2) - 1)
    def _():
        o_ref[...] = (acc_ref[...] * ix_ref[...] * iy_ref[...]).astype(o_ref.dtype)


def similarity(x, y, temp, *, tk_max=2048):
    """Pallas equivalent of Similarity(temp)(x.unsqueeze(1), y.unsqueeze(0)).

    x, y: [B, H] (float32 or bfloat16)
    returns: [B, B] float32
    """
    assert x.ndim == 2 and x.shape == y.shape
    B, H = x.shape
    itemsize = jnp.dtype(x.dtype).itemsize

    bp = _round_up(B, 128)
    hp = _round_up(H, 128)
    tm = tn = _pick_tile(bp)
    single_k = hp <= tk_max
    tk = hp if single_k else min(tk_max, hp)
    hp = _round_up(hp, tk)

    # Pad once in the wrapper: zero rows give zero dots (their eps-clamped inverse
    # norms multiply zeros -> exact 0); padded output rows/cols are sliced off.
    if (bp, hp) != (B, H):
        xp = jnp.pad(x, ((0, bp - B), (0, hp - H)))
        yp = jnp.pad(y, ((0, bp - B), (0, hp - H)))
    else:
        xp, yp = x, y

    # Precompute inverse norms (rank-1 normalization), 1/temp folded into inv_x.
    inv_temp = jnp.float32(1.0 / float(temp))
    xf = xp.astype(jnp.float32)
    yf = yp.astype(jnp.float32)
    inv_x = lax.rsqrt(jnp.maximum(jnp.sum(xf * xf, axis=-1, keepdims=True),
                                  _EPS * _EPS)) * inv_temp            # [bp, 1]
    inv_y = lax.rsqrt(jnp.maximum(jnp.sum(yf * yf, axis=-1),
                                  _EPS * _EPS))[None, :]              # [1, bp]

    grid_i, grid_j = bp // tm, bp // tn

    if single_k:
        grid = (grid_i, grid_j)
        in_specs = [
            pl.BlockSpec((tm, tk), lambda i, j: (i, 0)),
            pl.BlockSpec((tn, tk), lambda i, j: (j, 0)),
            pl.BlockSpec((tm, 1), lambda i, j: (i, 0)),
            pl.BlockSpec((1, tn), lambda i, j: (0, j)),
        ]
        out_specs = pl.BlockSpec((tm, tn), lambda i, j: (i, j))
        scratch_shapes = []
        kernel = _sim_kernel
        dim_sem = ("parallel", "parallel")
    else:
        grid = (grid_i, grid_j, hp // tk)
        in_specs = [
            pl.BlockSpec((tm, tk), lambda i, j, k: (i, k)),
            pl.BlockSpec((tn, tk), lambda i, j, k: (j, k)),
            pl.BlockSpec((tm, 1), lambda i, j, k: (i, 0)),
            pl.BlockSpec((1, tn), lambda i, j, k: (0, j)),
        ]
        out_specs = pl.BlockSpec((tm, tn), lambda i, j, k: (i, j))
        scratch_shapes = [pltpu.VMEM((tm, tn), jnp.float32)]
        kernel = _sim_kernel_ksplit
        dim_sem = ("parallel", "parallel", "arbitrary")

    # Advisory cost: includes the tiling reuse factor (x streamed grid_j times,
    # y streamed grid_i times) plus the output write and the inverse-norm reads.
    cost = pl.CostEstimate(
        flops=2 * bp * bp * hp,
        transcendentals=0,
        bytes_accessed=(itemsize * bp * hp * (grid_i + grid_j)
                        + 4 * bp * bp + 4 * 2 * bp))

    out = pl.pallas_call(
        kernel,
        out_shape=jax.ShapeDtypeStruct((bp, bp), jnp.float32),
        grid_spec=pltpu.PrefetchScalarGridSpec(
            num_scalar_prefetch=0,
            grid=grid,
            in_specs=in_specs,
            out_specs=out_specs,
            scratch_shapes=scratch_shapes),
        compiler_params=pltpu.CompilerParams(
            dimension_semantics=dim_sem,
            # Worst case with these tile caps (512x512 tiles, tk<=2048, f32,
            # double-buffered) is ~20 MiB; 40 MiB is safe on v5e/v6e/v7x.
            vmem_limit_bytes=40 * 1024 * 1024),
        cost_estimate=cost,
    )(xp, yp, inv_x, inv_y)

    if bp != B:
        out = out[:B, :B]
    return out


def _reference(x, y, temp):
    # Plain-JAX reference mirroring torch.nn.CosineSimilarity(dim=-1) on the
    # broadcast (B,1,H) x (1,B,H) call, without materializing the B*B*H tensor.
    xf = x.astype(jnp.float32)
    yf = y.astype(jnp.float32)
    num = jnp.matmul(xf, yf.T, precision=lax.Precision.HIGHEST)
    den = jnp.maximum(
        jnp.linalg.norm(xf, axis=-1)[:, None] * jnp.linalg.norm(yf, axis=-1)[None, :],
        _EPS)
    return num / den / temp


if __name__ == "__main__":
    key = jax.random.PRNGKey(0)
    kx, ky = jax.random.split(key)

    # Small shape matching the module's typical (B, H) contrastive use.
    B, H = 8, 32
    temp = 0.05
    x = jax.random.normal(kx, (B, H), dtype=jnp.float32)
    y = jax.random.normal(ky, (B, H), dtype=jnp.float32)

    out = similarity(x, y, temp)
    jax.block_until_ready(out)
    ref = _reference(x, y, temp)
    assert out.shape == (B, B)
    # Tolerance accounts for MXU default (bf16-pass) precision on f32 inputs
    # vs the HIGHEST-precision reference, amplified by 1/temp.
    err = float(jnp.max(jnp.abs(out - ref)))
    assert err < 5e-2, f"mismatch (small): max abs err = {err}"

    # Moderate shape exercising batch/hidden padding and the multi-tile grid.
    B2, H2 = 200, 700
    k2x, k2y = jax.random.split(jax.random.PRNGKey(1))
    x2 = jax.random.normal(k2x, (B2, H2), dtype=jnp.float32)
    y2 = jax.random.normal(k2y, (B2, H2), dtype=jnp.float32)
    out2 = similarity(x2, y2, 0.1)
    jax.block_until_ready(out2)
    ref2 = _reference(x2, y2, 0.1)
    assert out2.shape == (B2, B2)
    err2 = float(jnp.max(jnp.abs(out2 - ref2)))
    assert err2 < 2e-2, f"mismatch (tiled/padded): max abs err = {err2}"

    print("KERNEL_OK")
</pallas_src>

<mosaic_0001>
module attributes {stable_mosaic.version = 11 : i64} {
  func.func @_sim_kernel(%arg0: i32, %arg1: i32, %arg2: memref<128x128xf32, #tpu.memory_space<vmem>>, %arg3: memref<128x128xf32, #tpu.memory_space<vmem>>, %arg4: memref<128x1xf32, #tpu.memory_space<vmem>>, %arg5: memref<1x128xf32, #tpu.memory_space<vmem>>, %arg6: memref<128x128xf32, #tpu.memory_space<vmem>>) attributes {dimension_semantics = [#tpu.dimension_semantics<parallel>, #tpu.dimension_semantics<parallel>], iteration_bounds = array<i64: 1, 1>, scalar_prefetch = 0 : i64, scratch_operands = 0 : i64, tpu.core_type = #tpu.core_type<tc>, window_params = [{transform_indices = @transform_0, window_bounds = array<i64: 128, 128>}, {transform_indices = @transform_1, window_bounds = array<i64: 128, 128>}, {transform_indices = @transform_2, window_bounds = array<i64: 128, 1>}, {transform_indices = @transform_3, window_bounds = array<i64: 1, 128>}, {transform_indices = @transform_4, window_bounds = array<i64: 128, 128>}]} {
    %c0 = arith.constant 0 : index
    %c0_0 = arith.constant 0 : index
    %0 = vector.load %arg2[%c0, %c0_0] : memref<128x128xf32, #tpu.memory_space<vmem>>, vector<128x128xf32>
    %c0_1 = arith.constant 0 : index
    %c0_2 = arith.constant 0 : index
    %1 = vector.load %arg3[%c0_1, %c0_2] : memref<128x128xf32, #tpu.memory_space<vmem>>, vector<128x128xf32>
    %cst = arith.constant dense<0.000000e+00> : vector<128x128xf32>
    %2 = tpu.matmul %0, %1, %cst {dimension_numbers = #tpu.dot_dimension_numbers<[1], [1], [0], [0], [0, 0, 1, 0], [], []>} : vector<128x128xf32>, vector<128x128xf32>, vector<128x128xf32> -> vector<128x128xf32>
    %c0_3 = arith.constant 0 : index
    %c0_4 = arith.constant 0 : index
    %3 = vector.load %arg4[%c0_3, %c0_4] : memref<128x1xf32, #tpu.memory_space<vmem>>, vector<128x1xf32>
    %4 = vector.broadcast %3 : vector<128x1xf32> to vector<128x128xf32>
    %5 = arith.mulf %2, %4 : vector<128x128xf32>
    %c0_5 = arith.constant 0 : index
    %c0_6 = arith.constant 0 : index
    %6 = vector.load %arg5[%c0_5, %c0_6] : memref<1x128xf32, #tpu.memory_space<vmem>>, vector<1x128xf32>
    %7 = vector.broadcast %6 : vector<1x128xf32> to vector<128x128xf32>
    %8 = arith.mulf %5, %7 : vector<128x128xf32>
    %c0_7 = arith.constant 0 : index
    %c0_8 = arith.constant 0 : index
    %9 = vector.load %arg6[%c0_7, %c0_8] : memref<128x128xf32, #tpu.memory_space<vmem>>, vector<128x128xf32>
    tpu.vector_store %arg6[%c0_7, %c0_8], %8 {strides = array<i32>} : memref<128x128xf32, #tpu.memory_space<vmem>>, vector<128x128xf32>,
    return
  }
  func.func @transform_0(%arg0: i32, %arg1: i32) -> (i32, i32) {
    %c0_i32 = arith.constant 0 : i32
    %c0_i32_0 = arith.constant 0 : i32
    return %arg0, %c0_i32 : i32, i32
  }
  func.func @transform_1(%arg0: i32, %arg1: i32) -> (i32, i32) {
    %c0_i32 = arith.constant 0 : i32
    %c0_i32_0 = arith.constant 0 : i32
    return %arg1, %c0_i32 : i32, i32
  }
  func.func @transform_2(%arg0: i32, %arg1: i32) -> (i32, i32) {
    %c0_i32 = arith.constant 0 : i32
    %c0_i32_0 = arith.constant 0 : i32
    return %arg0, %c0_i32 : i32, i32
  }
  func.func @transform_3(%arg0: i32, %arg1: i32) -> (i32, i32) {
    %c0_i32 = arith.constant 0 : i32
    %c0_i32_0 = arith.constant 0 : i32
    return %c0_i32, %arg1 : i32, i32
  }
  func.func @transform_4(%arg0: i32, %arg1: i32) -> (i32, i32) {
    %c0_i32 = arith.constant 0 : i32
    return %arg0, %arg1 : i32, i32
  }
}

</mosaic_0001>

<bundles_post_ra>
// kernel: tpu_custom_call.1
= control target key start
LH: loop header
LB: loop body
LE: loop exit
PB: predicated region body
PF: predicated region fallthrough
CT: control target
= control target key end

     0   :  { %9 = vsyncpa [#allocation3], 0  ;;  %s566_s0 = inlined_call_operand.vmem [shape: f32[128,128], index: 0, kind: input, shape index: {}]   ;;  %s567_s1 = inlined_call_operand.hbm [shape: f32[128,128], index: 1, kind: input, shape index: {}]   ;;  %s568_s2 = inlined_call_operand.vmem [shape: f32[128,1], index: 2, kind: input, shape index: {}]   ;;  %s569_s3 = inlined_call_operand.vmem [shape: f32[1,128], index: 3, kind: input, shape index: {}]   ;;  %s570_s4 = inlined_call_operand.hbm [shape: f32[128,128], index: 4, kind: output, shape index: {}]  }
   0x1   :  { %10 = vsyncpa [#allocation4], 0  ;;  %s17_s17 = sshll.u32 %s567_s1, 4  ;;  %s407_s18 = smov [#allocation2]   ;;  %s18_s17 = int_to_ptr.hbm [resolvable:$true] %s17_s17 }
   0x2   :  { %s19_s19 = sshll.u32 %s407_s18, 4  ;;  %s408_s20 = smov 128   ;;  %s20_s19 = int_to_ptr.vmem [resolvable:$true] %s19_s19 }
   0x3   :  { %s409_s21 = smov 8  }
   0x4   :  { %25 = dma.hbm_to_vmem [thread:$0]  %s18_s17, 2048, %s20_s19, [#allocation3], %s408_s20, %s408_s20, %s409_s21  }
   0x5   :  { %403 = dma.done.wait [#allocation3], 2048  }
   0x6   :  { %404 = vsyncadd [#allocation3], 4294965248  ;;  %v410_v0 = vmov 0   ;;  %v65_v1 = vld [vmem:[#allocation2 + $0x78] sm:$0xff]  ;;  %v64_v2 = vld [vmem:[#allocation2 + $0x70] sm:$0xff]  ;;  %s285_s12 = sshll.u32 %s570_s4, 4  ;;  %s286_s12 = int_to_ptr.hbm [resolvable:$true] %s285_s12 }
   0x7   :  { %351 = vset.pattern.permute.xlu0 %v410_v0  ;;  %352 = vset.pattern.permute.xlu1 %v410_v0  ;;  %v131_v3 = vld [vmem:[%s568_s2] sm:$0xff]  ;;  %v63_v4 = vld [vmem:[#allocation2 + $0x68] sm:$0xff]  ;;  %v133_v5 = vld [vmem:[%s568_s2 + $0x10] sm:$0xff] }
   0x8   :  { %353 = vset.pattern.permute.xlu2 %v410_v0  ;;  %66 = vmatpush.xpose.msra.mxu0 %v65_v1  ;;  %v132_v6 = vld [vmem:[%s568_s2 + $0x8] sm:$0xff]  ;;  %v62_v7 = vld [vmem:[#allocation2 + $0x60] sm:$0xff]  ;;  %v61_v8 = vld [vmem:[#allocation2 + $0x58] sm:$0xff] }
   0x9   :  { %298 = vmatpush.xpose.msra.mxu1 %v65_v1  ;;  %299 = vmatpush.xpose.msra.mxu2 %v65_v1  ;;  %v134_v9 = vld [vmem:[%s568_s2 + $0x18] sm:$0xff]  ;;  %v137_v10 = vld [vmem:[%s568_s2 + $0x30] sm:$0xff]  ;;  %v59_v12 = vld [vmem:[#allocation2 + $0x48] sm:$0xff] }
   0xa   :  { %300 = vmatpush.xpose.msra.mxu3 %v65_v1  ;;  %149 = vperm.xlu0 %351, %v131_v3   ;;  %v60_v11 = vld [vmem:[#allocation2 + $0x50] sm:$0xff]  ;;  %v138_v13 = vld [vmem:[%s568_s2 + $0x38] sm:$0xff]  ;;  %v140_v14 = vld [vmem:[%s568_s2 + $0x48] sm:$0xff] }
   0xb   :  { %159 = vperm.xlu1 %352, %v133_v5   ;;  %v58_v15 = vld [vmem:[#allocation2 + $0x40] sm:$0xff]  ;;  %v57_v16 = vld [vmem:[#allocation2 + $0x38] sm:$0xff]  ;;  %v141_v19 = vld [vmem:[%s568_s2 + $0x50] sm:$0xff] }
   0xc   :  { %67 = vmatpush.xpose.msra.mxu0 %v64_v2  ;;  %v143_v17 = vld [vmem:[%s568_s2 + $0x60] sm:$0xff]  ;;  %v56_v20 = vld [vmem:[#allocation2 + $0x30] sm:$0xff]  ;;  %v55_v21 = vld [vmem:[#allocation2 + $0x28] sm:$0xff] }
   0xd   :  { %301 = vmatpush.xpose.msra.mxu1 %v64_v2  ;;  %302 = vmatpush.xpose.msra.mxu2 %v64_v2  ;;  %v135_v18 = vld [vmem:[%s568_s2 + $0x20] sm:$0xff]  ;;  %v146_v22 = vld [vmem:[%s568_s2 + $0x78] sm:$0xff]  ;;  %v136_v23 = vld [vmem:[%s568_s2 + $0x28] sm:$0xff] }
   0xe   :  { %303 = vmatpush.xpose.msra.mxu3 %v64_v2  ;;  %169 = vperm.xlu2 %353, %v135_v18   ;;  %v144_v24 = vld [vmem:[%s568_s2 + $0x68] sm:$0xff]  ;;  %v54_v25 = vld [vmem:[#allocation2 + $0x20] sm:$0xff]  ;;  %v53_v26 = vld [vmem:[#allocation2 + $0x18] sm:$0xff] }
   0xf   :  { %v139_v27 = vld [vmem:[%s568_s2 + $0x40] sm:$0xff]  ;;  %v52_v28 = vld [vmem:[#allocation2 + $0x10] sm:$0xff]  ;;  %v51_v29 = vld [vmem:[#allocation2 + $0x8] sm:$0xff] }
  0x10   :  { %68 = vmatpush.xpose.msra.mxu0 %v63_v4  ;;  %v142_v30 = vld [vmem:[%s568_s2 + $0x58] sm:$0xff]  ;;  %v50_v31 = vld [vmem:[#allocation2] sm:$0xff]  ;;  %v145_v36 = vld [vmem:[%s568_s2 + $0x70] sm:$0xff] }
  0x11   :  { %304 = vmatpush.xpose.msra.mxu1 %v63_v4  ;;  %305 = vmatpush.xpose.msra.mxu2 %v63_v4  ;;  %v34_v32 = vld [vmem:[%s566_s0] sm:$0xff]  ;;  %v35_v37 = vld [vmem:[%s566_s0 + $0x8] sm:$0xff]  ;;  %v36_v41 = vld [vmem:[%s566_s0 + $0x10] sm:$0xff] }
  0x12   :  { %306 = vmatpush.xpose.msra.mxu3 %v63_v4  ;;  %154 = vperm.xlu0 %351, %v132_v6   ;;  %v38_v33 = vld [vmem:[%s566_s0 + $0x20] sm:$0xff]  ;;  %v39_v38 = vld [vmem:[%s566_s0 + $0x28] sm:$0xff]  ;;  %v40_v42 = vld [vmem:[%s566_s0 + $0x30] sm:$0xff] }
  0x13   :  { %164 = vperm.xlu1 %352, %v134_v9   ;;  %v42_v34 = vld [vmem:[%s566_s0 + $0x40] sm:$0xff]  ;;  %v43_v39 = vld [vmem:[%s566_s0 + $0x48] sm:$0xff]  ;;  %v44_v43 = vld [vmem:[%s566_s0 + $0x50] sm:$0xff] }
  0x14   :  { %69 = vmatpush.xpose.msra.mxu0 %v62_v7  ;;  %v46_v35 = vld [vmem:[%s566_s0 + $0x60] sm:$0xff]  ;;  %v47_v40 = vld [vmem:[%s566_s0 + $0x68] sm:$0xff]  ;;  %v48_v44 = vld [vmem:[%s566_s0 + $0x70] sm:$0xff] }
  0x15   :  { %307 = vmatpush.xpose.msra.mxu1 %v62_v7  ;;  %308 = vmatpush.xpose.msra.mxu2 %v62_v7  ;;  %v37_v45 = vld [vmem:[%s566_s0 + $0x18] sm:$0xff]  ;;  %v542_v58 = vld [vmem:[%s569_s3] ss:$0 sm:$0xff] }
  0x16   :  { %309 = vmatpush.xpose.msra.mxu3 %v62_v7  ;;  %174 = vperm.xlu2 %353, %v136_v23   ;;  %v41_v46 = vld [vmem:[%s566_s0 + $0x38] sm:$0xff] }
  0x17   :  { %v45_v47 = vld [vmem:[%s566_s0 + $0x58] sm:$0xff] }
  0x18   :  { %70 = vmatpush.xpose.msra.mxu0 %v61_v8  ;;  %v49_v48 = vld [vmem:[%s566_s0 + $0x78] sm:$0xff]  ;;  %s411_s0 = smov [#allocation5]  }
  0x19   :  { %310 = vmatpush.xpose.msra.mxu1 %v61_v8  ;;  %311 = vmatpush.xpose.msra.mxu2 %v61_v8  ;;  %s283_s3 = sshll.u32 %s411_s0, 4  ;;  %s284_s3 = int_to_ptr.vmem [resolvable:$true] %s283_s3 }
  0x1a   :  { %312 = vmatpush.xpose.msra.mxu3 %v61_v8  ;;  %179 = vperm.xlu0 %351, %v137_v10  }
  0x1b   :  { %184 = vperm.xlu1 %352, %v138_v13  }
  0x1c   :  { %71 = vmatpush.xpose.msra.mxu0 %v60_v11 }
  0x1d   :  { %313 = vmatpush.xpose.msra.mxu1 %v60_v11  ;;  %314 = vmatpush.xpose.msra.mxu2 %v60_v11 }
  0x1e   :  { %315 = vmatpush.xpose.msra.mxu3 %v60_v11  ;;  %189 = vperm.xlu2 %353, %v139_v27  }
  0x20   :  { %72 = vmatpush.xpose.msra.mxu0 %v59_v12 }
  0x21   :  { %316 = vmatpush.xpose.msra.mxu1 %v59_v12  ;;  %317 = vmatpush.xpose.msra.mxu2 %v59_v12 }
  0x22   :  { %318 = vmatpush.xpose.msra.mxu3 %v59_v12  ;;  %194 = vperm.xlu0 %351, %v140_v14  }
  0x23   :  { %199 = vperm.xlu1 %352, %v141_v19  }
  0x24   :  { %73 = vmatpush.xpose.msra.mxu0 %v58_v15 }
  0x25   :  { %319 = vmatpush.xpose.msra.mxu1 %v58_v15  ;;  %320 = vmatpush.xpose.msra.mxu2 %v58_v15 }
  0x26   :  { %321 = vmatpush.xpose.msra.mxu3 %v58_v15  ;;  %204 = vperm.xlu2 %353, %v142_v30  }
  0x28   :  { %74 = vmatpush.xpose.msra.mxu0 %v57_v16 }
  0x29   :  { %322 = vmatpush.xpose.msra.mxu1 %v57_v16  ;;  %323 = vmatpush.xpose.msra.mxu2 %v57_v16 }
  0x2a   :  { %324 = vmatpush.xpose.msra.mxu3 %v57_v16  ;;  %209 = vperm.xlu0 %351, %v143_v17  }
  0x2b   :  { %214 = vperm.xlu1 %352, %v144_v24  }
  0x2c   :  { %75 = vmatpush.xpose.msra.mxu0 %v56_v20 }
  0x2d   :  { %325 = vmatpush.xpose.msra.mxu1 %v56_v20  ;;  %326 = vmatpush.xpose.msra.mxu2 %v56_v20 }
  0x2e   :  { %327 = vmatpush.xpose.msra.mxu3 %v56_v20  ;;  %219 = vperm.xlu2 %353, %v145_v36  }
  0x30   :  { %76 = vmatpush.xpose.msra.mxu0 %v55_v21 }
  0x31   :  { %328 = vmatpush.xpose.msra.mxu1 %v55_v21  ;;  %329 = vmatpush.xpose.msra.mxu2 %v55_v21 }
  0x32   :  { %330 = vmatpush.xpose.msra.mxu3 %v55_v21  ;;  %224 = vperm.xlu0 %351, %v146_v22  }
  0x34   :  { %77 = vmatpush.xpose.msra.mxu0 %v54_v25 }
  0x35   :  { %331 = vmatpush.xpose.msra.mxu1 %v54_v25  ;;  %332 = vmatpush.xpose.msra.mxu2 %v54_v25 }
  0x36   :  { %333 = vmatpush.xpose.msra.mxu3 %v54_v25 }
  0x38   :  { %78 = vmatpush.xpose.msra.mxu0 %v53_v26 }
  0x39   :  { %334 = vmatpush.xpose.msra.mxu1 %v53_v26  ;;  %335 = vmatpush.xpose.msra.mxu2 %v53_v26 }
  0x3a   :  { %336 = vmatpush.xpose.msra.mxu3 %v53_v26 }
  0x3c   :  { %79 = vmatpush.xpose.msra.mxu0 %v52_v28 }
  0x3d   :  { %337 = vmatpush.xpose.msra.mxu1 %v52_v28  ;;  %338 = vmatpush.xpose.msra.mxu2 %v52_v28 }
  0x3e   :  { %339 = vmatpush.xpose.msra.mxu3 %v52_v28 }
  0x40   :  { %80 = vmatpush.xpose.msra.mxu0 %v51_v29 }
  0x41   :  { %340 = vmatpush.xpose.msra.mxu1 %v51_v29  ;;  %341 = vmatpush.xpose.msra.mxu2 %v51_v29 }
  0x42   :  { %342 = vmatpush.xpose.msra.mxu3 %v51_v29 }
  0x44   :  { %81 = vmatpush.xpose.msra.mxu0 %v50_v31 }
  0x45   :  { %343 = vmatpush.xpose.msra.mxu1 %v50_v31  ;;  %344 = vmatpush.xpose.msra.mxu2 %v50_v31 }
  0x46   :  { %345 = vmatpush.xpose.msra.mxu3 %v50_v31 }
  0x47   :  { %82 = vmatmul.f32.vlgmr.msra.gmra.mxu0 %v34_v32 }
  0x48   :  { %94 = vmatmul.f32.vlgmr.msra.gmra.mxu1 %v38_v33  ;;  %106 = vmatmul.f32.vlgmr.msra.gmra.mxu2 %v42_v34 }
  0x49   :  { %118 = vmatmul.f32.vlgmr.msra.gmra.mxu3 %v46_v35 }
  0x4f   :  { %85 = vmatmul.f32.gmra.mxu0 %v35_v37 }
  0x50   :  { %97 = vmatmul.f32.gmra.mxu1 %v39_v38  ;;  %109 = vmatmul.f32.gmra.mxu2 %v43_v39 }
  0x51   :  { %121 = vmatmul.f32.gmra.mxu3 %v47_v40 }
  0x57   :  { %88 = vmatmul.f32.gmra.mxu0 %v36_v41 }
  0x58   :  { %100 = vmatmul.f32.gmra.mxu1 %v40_v42  ;;  %112 = vmatmul.f32.gmra.mxu2 %v44_v43 }
  0x59   :  { %124 = vmatmul.f32.gmra.mxu3 %v48_v44 }
  0x5f   :  { %91 = vmatmul.f32.gmra.mxu0 %v37_v45 }
  0x60   :  { %103 = vmatmul.f32.gmra.mxu1 %v41_v46  ;;  %115 = vmatmul.f32.gmra.mxu2 %v45_v47 }
  0x61   :  { %127 = vmatmul.f32.gmra.mxu3 %v49_v48 }
  0x68   :  { %v170_v52 = vpop.permute.xlu2 %169 }
  0x70   :  { %v175_v55 = vpop.permute.xlu2 %174 }
  0x78   :  { %v190_v63 = vpop.permute.xlu2 %189 }
  0x7c   :  { %v150_v49 = vpop.permute.xlu0 %149 }
  0x7d   :  { %v160_v50 = vpop.permute.xlu1 %159 }
  0x80   :  { %v205_v16 = vpop.permute.xlu2 %204 }
  0x84   :  { %v155_v51 = vpop.permute.xlu0 %154 }
  0x85   :  { %v165_v53 = vpop.permute.xlu1 %164 }
  0x88   :  { %v220_v30 = vpop.permute.xlu2 %219 }
  0x8c   :  { %v180_v54 = vpop.permute.xlu0 %179 }
  0x8d   :  { %v185_v56 = vpop.permute.xlu1 %184 }
  0x94   :  { %v195_v57 = vpop.permute.xlu0 %194 }
  0x95   :  { %v200_v2 = vpop.permute.xlu1 %199 }
  0x9c   :  { %v210_v3 = vpop.permute.xlu0 %209 }
  0x9d   :  { %v215_v17 = vpop.permute.xlu1 %214 }
  0xa4   :  { %v225_v43 = vpop.permute.xlu0 %224 }
  0xc4   :  { %v83_v59 = vpop.f32.mrf.mxu0 }
  0xc5   :  { %v95_v60 = vpop.f32.mrf.mxu1  ;;  %v227_v61 = vmul.f32 %v150_v49, %v83_v59 }
  0xc6   :  { %v231_v62 = vmul.f32 %v170_v52, %v95_v60 }
  0xc7   :  { %v247_v0 = vmul.f32 %v542_v58, %v227_v61 }
  0xc8   :  { %v251_v1 = vmul.f32 %v542_v58, %v231_v62 }
  0xc9   :  { %263 = vst [vmem:[#allocation5] sm:$0xff] %v247_v0 }
  0xca   :  { %267 = vst [vmem:[#allocation5 + $0x20] sm:$0xff] %v251_v1 }
  0xcb   :  { %v107_v4 = vpop.f32.mrf.mxu2 }
  0xcc   :  { %v119_v5 = vpop.f32.mrf.mxu3  ;;  %v235_v6 = vmul.f32 %v190_v63, %v107_v4  ;;  %v86_v8 = vpop.f32.mrf.mxu0 }
  0xcd   :  { %v239_v7 = vmul.f32 %v210_v3, %v119_v5  ;;  %v98_v9 = vpop.f32.mrf.mxu1  ;;  %v228_v10 = vmul.f32 %v155_v51, %v86_v8 }
  0xce   :  { %v232_v11 = vmul.f32 %v175_v55, %v98_v9  ;;  %v255_v12 = vmul.f32 %v542_v58, %v235_v6 }
  0xcf   :  { %v259_v13 = vmul.f32 %v542_v58, %v239_v7  ;;  %v248_v14 = vmul.f32 %v542_v58, %v228_v10 }
  0xd0   :  { %v252_v15 = vmul.f32 %v542_v58, %v232_v11  ;;  %271 = vst [vmem:[#allocation5 + $0x40] sm:$0xff] %v255_v12 }
  0xd1   :  { %275 = vst [vmem:[#allocation5 + $0x60] sm:$0xff] %v259_v13 }
  0xd2   :  { %264 = vst [vmem:[#allocation5 + $0x8] sm:$0xff] %v248_v14 }
  0xd3   :  { %268 = vst [vmem:[#allocation5 + $0x28] sm:$0xff] %v252_v15  ;;  %v110_v18 = vpop.f32.mrf.mxu2 }
  0xd4   :  { %v122_v19 = vpop.f32.mrf.mxu3  ;;  %v236_v20 = vmul.f32 %v195_v57, %v110_v18  ;;  %v89_v22 = vpop.f32.mrf.mxu0 }
  0xd5   :  { %v240_v21 = vmul.f32 %v215_v17, %v122_v19  ;;  %v101_v23 = vpop.f32.mrf.mxu1  ;;  %v229_v24 = vmul.f32 %v160_v50, %v89_v22 }
  0xd6   :  { %v233_v25 = vmul.f32 %v180_v54, %v101_v23  ;;  %v256_v26 = vmul.f32 %v542_v58, %v236_v20 }
  0xd7   :  { %v260_v27 = vmul.f32 %v542_v58, %v240_v21  ;;  %v249_v28 = vmul.f32 %v542_v58, %v229_v24 }
  0xd8   :  { %v253_v29 = vmul.f32 %v542_v58, %v233_v25  ;;  %272 = vst [vmem:[#allocation5 + $0x48] sm:$0xff] %v256_v26 }
  0xd9   :  { %276 = vst [vmem:[#allocation5 + $0x68] sm:$0xff] %v260_v27 }
  0xda   :  { %265 = vst [vmem:[#allocation5 + $0x10] sm:$0xff] %v249_v28 }
  0xdb   :  { %269 = vst [vmem:[#allocation5 + $0x30] sm:$0xff] %v253_v29  ;;  %v113_v31 = vpop.f32.mrf.mxu2 }
  0xdc   :  { %v125_v32 = vpop.f32.mrf.mxu3  ;;  %v237_v33 = vmul.f32 %v200_v2, %v113_v31  ;;  %v92_v35 = vpop.f32.mrf.mxu0 }
  0xdd   :  { %v241_v34 = vmul.f32 %v220_v30, %v125_v32  ;;  %v104_v36 = vpop.f32.mrf.mxu1  ;;  %v230_v37 = vmul.f32 %v165_v53, %v92_v35 }
  0xde   :  { %v234_v38 = vmul.f32 %v185_v56, %v104_v36  ;;  %v257_v39 = vmul.f32 %v542_v58, %v237_v33 }
  0xdf   :  { %v261_v40 = vmul.f32 %v542_v58, %v241_v34  ;;  %v250_v41 = vmul.f32 %v542_v58, %v230_v37 }
  0xe0   :  { %v254_v42 = vmul.f32 %v542_v58, %v234_v38  ;;  %273 = vst [vmem:[#allocation5 + $0x50] sm:$0xff] %v257_v39 }
  0xe1   :  { %277 = vst [vmem:[#allocation5 + $0x70] sm:$0xff] %v261_v40 }
  0xe2   :  { %266 = vst [vmem:[#allocation5 + $0x18] sm:$0xff] %v250_v41 }
  0xe3   :  { %270 = vst [vmem:[#allocation5 + $0x38] sm:$0xff] %v254_v42  ;;  %v116_v44 = vpop.f32.mrf.mxu2 }
  0xe4   :  { %v128_v45 = vpop.f32.mrf.mxu3  ;;  %v238_v46 = vmul.f32 %v205_v16, %v116_v44 }
  0xe5   :  { %v242_v47 = vmul.f32 %v225_v43, %v128_v45 }
  0xe6   :  { %v258_v48 = vmul.f32 %v542_v58, %v238_v46 }
  0xe7   :  { %v262_v49 = vmul.f32 %v542_v58, %v242_v47 }
  0xe8   :  { %274 = vst [vmem:[#allocation5 + $0x58] sm:$0xff] %v258_v48 }
  0xe9   :  { %278 = vst [vmem:[#allocation5 + $0x78] sm:$0xff] %v262_v49 }
  0xea   :  { %291 = dma.vmem_to_hbm [thread:$0]  %s284_s3, 2048, %s286_s12, [#allocation4], %s408_s20, %s408_s20, %s409_s21  }
  0xeb   :  { %405 = dma.done.wait [#allocation4], 2048  }
  0xec   :  { %406 = vsyncadd [#allocation4], 4294965248 }
  0xed   :  { %296 = vsyncpa [#allocation3], 1 }
  0xee   :  { %297 = vsyncpa [#allocation4], 1 }

</bundles_post_ra>
